<compile_context>
chip_gen: v7x
topology: tpu7x:2x2x1
jax: 0.10.0
libtpu: 0.0.40
codegen_flags: <defaults>
</compile_context>

<pallas_src>
import jax
import jax.numpy as jnp
from jax.experimental import pallas as pl
from jax.experimental.pallas import tpu as pltpu

K_IN = 784                 # input features
H_RAW, H_PAD = 200, 256    # hidden dim, padded to one 256-wide MXU tile
N_RAW, N_PAD = 10, 128     # output dim, padded to one lane-dense 128 tile


def mlp_kernel(x_ref, w1_ref, b1_ref, w2_ref, b2_ref, o_ref):
    # (TB, 784) bf16 @ (784, 256) bf16 -> f32 accumulate on the MXU.
    h = jnp.dot(x_ref[...], w1_ref[...], preferred_element_type=jnp.float32)
    h = jnp.maximum(h + b1_ref[...], 0.0)                       # f32 bias + relu (VPU)
    # (TB, 256) bf16 @ (256, 128) bf16 -> f32.  Pad lanes carry a -1e30 bias.
    logits = jnp.dot(h.astype(jnp.bfloat16), w2_ref[...],
                     preferred_element_type=jnp.float32) + b2_ref[...]
    # Numerically stable log_softmax over the last axis.  The -1e30 pad lanes
    # never win the max and underflow to 0 in exp(), so the real-lane result
    # is identical to an unpadded 10-wide log_softmax.
    m = jnp.max(logits, axis=-1, keepdims=True)
    shifted = logits - m
    lse = jnp.log(jnp.sum(jnp.exp(shifted), axis=-1, keepdims=True))
    o_ref[...] = (shifted - lse).astype(o_ref.dtype)            # lane-dense (TB, 128) store


def mlp_forward(x, w1, b1, w2, b2, *, tb_max=512):
    """x: (B, 784) f32. w1: (784, 200), b1: (200,), w2: (200, 10), b2: (10,)."""
    B = x.shape[0]

    # --- pad parameters to MXU / lane friendly shapes (exact; see kernel) ---
    w1p = jnp.zeros((K_IN, H_PAD), jnp.float32).at[:, :H_RAW].set(w1).astype(jnp.bfloat16)
    b1p = jnp.zeros((1, H_PAD), jnp.float32).at[0, :H_RAW].set(b1)
    w2p = jnp.zeros((H_PAD, N_PAD), jnp.float32).at[:H_RAW, :N_RAW].set(w2).astype(jnp.bfloat16)
    b2p = jnp.full((1, N_PAD), -1e30, jnp.float32).at[0, :N_RAW].set(b2)

    # --- batch tiling: a single tile for small B, 512-row tiles otherwise ---
    if B <= tb_max:
        tb = max(8, -(-B // 8) * 8)          # round up to a sublane multiple
    else:
        tb = tb_max
    bp = -(-B // tb) * tb                    # padded batch (zero rows, sliced off below)
    xp = jnp.zeros((bp, K_IN), jnp.float32).at[:B].set(x).astype(jnp.bfloat16)

    flops = 2 * bp * (K_IN * H_PAD + H_PAD * N_PAD)
    bytes_accessed = (xp.size * 2 + w1p.size * 2 + w2p.size * 2
                      + b1p.size * 4 + b2p.size * 4 + bp * N_PAD * 4)

    out = pl.pallas_call(
        mlp_kernel,
        out_shape=jax.ShapeDtypeStruct((bp, N_PAD), jnp.float32),
        grid=(bp // tb,),
        in_specs=[
            pl.BlockSpec((tb, K_IN), lambda i: (i, 0)),        # x: streamed / pipelined per tile
            pl.BlockSpec((K_IN, H_PAD), lambda i: (0, 0)),     # w1: VMEM-resident
            pl.BlockSpec((1, H_PAD), lambda i: (0, 0)),        # b1: VMEM-resident
            pl.BlockSpec((H_PAD, N_PAD), lambda i: (0, 0)),    # w2: VMEM-resident
            pl.BlockSpec((1, N_PAD), lambda i: (0, 0)),        # b2: VMEM-resident
        ],
        out_specs=pl.BlockSpec((tb, N_PAD), lambda i: (i, 0)),  # lane-dense output tile
        compiler_params=pltpu.CompilerParams(
            dimension_semantics=("parallel",)),                 # shard batch tiles across TCs (v7x)
        cost_estimate=pl.CostEstimate(
            flops=flops,
            transcendentals=bp * (N_PAD + 1),
            bytes_accessed=bytes_accessed),
    )(xp, w1p, b1p, w2p, b2p)
    # Slice padded rows / pad lanes back off.
    return out[:B, :N_RAW]


def init_params(key):
    # Deterministic init mimicking nn.Linear's uniform(-1/sqrt(fan_in), 1/sqrt(fan_in)).
    k1, k2, k3, k4 = jax.random.split(key, 4)
    lim1 = 1.0 / jnp.sqrt(784.0)
    lim2 = 1.0 / jnp.sqrt(200.0)
    # Stored already transposed relative to PyTorch: (in, out).
    w1 = jax.random.uniform(k1, (784, 200), jnp.float32, -lim1, lim1)
    b1 = jax.random.uniform(k2, (200,), jnp.float32, -lim1, lim1)
    w2 = jax.random.uniform(k3, (200, 10), jnp.float32, -lim2, lim2)
    b2 = jax.random.uniform(k4, (10,), jnp.float32, -lim2, lim2)
    return w1, b1, w2, b2


if __name__ == "__main__":
    key = jax.random.PRNGKey(0)
    kx, kp = jax.random.split(key)
    w1, b1, w2, b2 = init_params(kp)

    mlp_jit = jax.jit(mlp_forward)

    def reference(x):
        # Same math as the kernel: bf16 MXU operands, f32 accumulate / element-wise.
        h = jnp.dot(x.astype(jnp.bfloat16), w1.astype(jnp.bfloat16),
                    preferred_element_type=jnp.float32) + b1
        h = jnp.maximum(h, 0.0)
        logits = jnp.dot(h.astype(jnp.bfloat16), w2.astype(jnp.bfloat16),
                         preferred_element_type=jnp.float32) + b2
        return jax.nn.log_softmax(logits, axis=-1)

    # Exercise both the single-tile path (B=8) and the multi-tile, padded-batch
    # path (B=520 -> TB=512, grid=2).
    for B in (8, 520):
        x = jax.random.normal(jax.random.fold_in(kx, B), (B, 784), jnp.float32)
        y = mlp_jit(x, w1, b1, w2, b2)
        jax.block_until_ready(y)
        y_ref = reference(x)
        assert y.shape == (B, 10)
        assert bool(jnp.allclose(y, y_ref, atol=2e-3, rtol=2e-3)), (
            "max abs err", float(jnp.max(jnp.abs(y - y_ref))))

    print("KERNEL_OK")
</pallas_src>

<mosaic_0001>
module attributes {stable_mosaic.version = 11 : i64} {
  func.func @mlp_kernel(%arg0: i32, %arg1: memref<8x784xbf16, #tpu.memory_space<vmem>>, %arg2: memref<784x256xbf16, #tpu.memory_space<vmem>>, %arg3: memref<1x256xf32, #tpu.memory_space<vmem>>, %arg4: memref<256x128xbf16, #tpu.memory_space<vmem>>, %arg5: memref<1x128xf32, #tpu.memory_space<vmem>>, %arg6: memref<8x128xf32, #tpu.memory_space<vmem>>) attributes {dimension_semantics = [#tpu.dimension_semantics<parallel>], iteration_bounds = array<i64: 1>, scalar_prefetch = 0 : i64, scratch_operands = 0 : i64, tpu.core_type = #tpu.core_type<tc>, window_params = [{transform_indices = @transform_0, window_bounds = array<i64: 8, 784>}, {pipeline_mode = #tpu.pipeline_mode<synchronous>, transform_indices = @transform_1, window_bounds = array<i64: 784, 256>}, {pipeline_mode = #tpu.pipeline_mode<synchronous>, transform_indices = @transform_2, window_bounds = array<i64: 1, 256>}, {pipeline_mode = #tpu.pipeline_mode<synchronous>, transform_indices = @transform_3, window_bounds = array<i64: 256, 128>}, {pipeline_mode = #tpu.pipeline_mode<synchronous>, transform_indices = @transform_4, window_bounds = array<i64: 1, 128>}, {transform_indices = @transform_5, window_bounds = array<i64: 8, 128>}]} {
    %c0 = arith.constant 0 : index
    %c0_0 = arith.constant 0 : index
    %0 = vector.load %arg1[%c0, %c0_0] : memref<8x784xbf16, #tpu.memory_space<vmem>>, vector<8x784xbf16>
    %c0_1 = arith.constant 0 : index
    %c0_2 = arith.constant 0 : index
    %1 = vector.load %arg2[%c0_1, %c0_2] : memref<784x256xbf16, #tpu.memory_space<vmem>>, vector<784x256xbf16>
    %cst = arith.constant dense<0.000000e+00> : vector<8x256xf32>
    %2 = tpu.matmul %0, %1, %cst {dimension_numbers = #tpu.dot_dimension_numbers<[1], [0], [0], [1], [0, 0, 1, 1], [], []>} : vector<8x784xbf16>, vector<784x256xbf16>, vector<8x256xf32> -> vector<8x256xf32>
    %c0_3 = arith.constant 0 : index
    %c0_4 = arith.constant 0 : index
    %3 = vector.load %arg3[%c0_3, %c0_4] : memref<1x256xf32, #tpu.memory_space<vmem>>, vector<1x256xf32>
    %4 = vector.broadcast %3 : vector<1x256xf32> to vector<8x256xf32>
    %5 = arith.addf %2, %4 : vector<8x256xf32>
    %cst_5 = arith.constant 0.000000e+00 : f32
    %6 = vector.broadcast %cst_5 : f32 to vector<8x256xf32>
    %7 = arith.maximumf %5, %6 : vector<8x256xf32>
    %8 = arith.truncf %7 : vector<8x256xf32> to vector<8x256xbf16>
    %c0_6 = arith.constant 0 : index
    %c0_7 = arith.constant 0 : index
    %9 = vector.load %arg4[%c0_6, %c0_7] : memref<256x128xbf16, #tpu.memory_space<vmem>>, vector<256x128xbf16>
    %cst_8 = arith.constant dense<0.000000e+00> : vector<8x128xf32>
    %10 = tpu.matmul %8, %9, %cst_8 {dimension_numbers = #tpu.dot_dimension_numbers<[1], [0], [0], [1], [0, 0, 1, 1], [], []>} : vector<8x256xbf16>, vector<256x128xbf16>, vector<8x128xf32> -> vector<8x128xf32>
    %c0_9 = arith.constant 0 : index
    %c0_10 = arith.constant 0 : index
    %11 = vector.load %arg5[%c0_9, %c0_10] : memref<1x128xf32, #tpu.memory_space<vmem>>, vector<1x128xf32>
    %12 = vector.broadcast %11 : vector<1x128xf32> to vector<8x128xf32>
    %13 = arith.addf %10, %12 : vector<8x128xf32>
    %cst_11 = arith.constant dense<0xFF800000> : vector<8xf32>
    %14 = vector.multi_reduction <maximumf>, %13, %cst_11 [1] : vector<8x128xf32> to vector<8xf32>
    %15 = vector.shape_cast %14 : vector<8xf32> to vector<8x1xf32>
    %16 = vector.broadcast %15 : vector<8x1xf32> to vector<8x128xf32>
    %17 = arith.subf %13, %16 : vector<8x128xf32>
    %18 = math.exp %17 : vector<8x128xf32>
    %cst_12 = arith.constant dense<0.000000e+00> : vector<8xf32>
    %19 = vector.multi_reduction <add>, %18, %cst_12 [1] : vector<8x128xf32> to vector<8xf32>
    %20 = vector.shape_cast %19 : vector<8xf32> to vector<8x1xf32>
    %21 = math.log %20 : vector<8x1xf32>
    %22 = vector.broadcast %21 : vector<8x1xf32> to vector<8x128xf32>
    %23 = arith.subf %17, %22 : vector<8x128xf32>
    %c0_13 = arith.constant 0 : index
    %c0_14 = arith.constant 0 : index
    %24 = vector.load %arg6[%c0_13, %c0_14] : memref<8x128xf32, #tpu.memory_space<vmem>>, vector<8x128xf32>
    tpu.vector_store %arg6[%c0_13, %c0_14], %23 {strides = array<i32>} : memref<8x128xf32, #tpu.memory_space<vmem>>, vector<8x128xf32>,
    return
  }
  func.func @transform_0(%arg0: i32) -> (i32, i32) {
    %c0_i32 = arith.constant 0 : i32
    %c0_i32_0 = arith.constant 0 : i32
    return %arg0, %c0_i32 : i32, i32
  }
  func.func @transform_1(%arg0: i32) -> (i32, i32) {
    %c0_i32 = arith.constant 0 : i32
    %c0_i32_0 = arith.constant 0 : i32
    %c0_i32_1 = arith.constant 0 : i32
    return %c0_i32, %c0_i32_0 : i32, i32
  }
  func.func @transform_2(%arg0: i32) -> (i32, i32) {
    %c0_i32 = arith.constant 0 : i32
    %c0_i32_0 = arith.constant 0 : i32
    %c0_i32_1 = arith.constant 0 : i32
    return %c0_i32, %c0_i32_0 : i32, i32
  }
  func.func @transform_3(%arg0: i32) -> (i32, i32) {
    %c0_i32 = arith.constant 0 : i32
    %c0_i32_0 = arith.constant 0 : i32
    %c0_i32_1 = arith.constant 0 : i32
    return %c0_i32, %c0_i32_0 : i32, i32
  }
  func.func @transform_4(%arg0: i32) -> (i32, i32) {
    %c0_i32 = arith.constant 0 : i32
    %c0_i32_0 = arith.constant 0 : i32
    %c0_i32_1 = arith.constant 0 : i32
    return %c0_i32, %c0_i32_0 : i32, i32
  }
  func.func @transform_5(%arg0: i32) -> (i32, i32) {
    %c0_i32 = arith.constant 0 : i32
    %c0_i32_0 = arith.constant 0 : i32
    return %arg0, %c0_i32 : i32, i32
  }
}

</mosaic_0001>

<bundles_post_ra>
// kernel: mlp_forward.1
= control target key start
LH: loop header
LB: loop body
LE: loop exit
PB: predicated region body
PF: predicated region fallthrough
CT: control target
= control target key end

     0   :  { %s1793_s0 = inlined_call_operand.vmem [shape: bf16[8,784], index: 0, kind: input, shape index: {}]   ;;  %s1794_s1 = inlined_call_operand.vmem [shape: bf16[784,256], index: 1, kind: input, shape index: {}]   ;;  %s1795_s2 = inlined_call_operand.vmem [shape: f32[1,256], index: 2, kind: input, shape index: {}]   ;;  %s1796_s3 = inlined_call_operand.vmem [shape: bf16[256,128], index: 3, kind: input, shape index: {}]   ;;  %s1797_s4 = inlined_call_operand.vmem [shape: f32[1,128], index: 4, kind: input, shape index: {}]   ;;  %s1798_s5 = inlined_call_operand.hbm [shape: f32[8,128], index: 5, kind: output, shape index: {}]  }
   0x1   :  { %v1179_v0 = vld [vmem:[%s1794_s1 + $0x104] ss:$8 sps:$4 sm:$0xff]   ;;  %v1181_v1 = vld [vmem:[%s1794_s1 + $0x100] ss:$8 sps:$4 sm:$0xff]   ;;  %v1182_v2 = vld [vmem:[%s1794_s1 + $0x114] ss:$8 sps:$4 sm:$0xff]  }
   0x2   :  { %695 = vmatprep.subr.bf16.mxu0 %v1179_v0  ;;  %v1184_v3 = vld [vmem:[%s1794_s1 + $0x110] ss:$8 sps:$4 sm:$0xff]   ;;  %v1185_v4 = vld [vmem:[%s1794_s1 + $0x124] ss:$8 sps:$4 sm:$0xff]   ;;  %v1187_v5 = vld [vmem:[%s1794_s1 + $0x120] ss:$8 sps:$4 sm:$0xff]  }
   0x3   :  { %696 = vmatpush1.bf16.msra.mxu0 %v1181_v1  ;;  %v1188_v6 = vld [vmem:[%s1794_s1 + $0x134] ss:$8 sps:$4 sm:$0xff]   ;;  %v1190_v7 = vld [vmem:[%s1794_s1 + $0x130] ss:$8 sps:$4 sm:$0xff]   ;;  %v1191_v8 = vld [vmem:[%s1794_s1 + $0x144] ss:$8 sps:$4 sm:$0xff]  }
   0x4   :  { %697 = vmatprep.subr.bf16.mxu0 %v1182_v2  ;;  %v1193_v9 = vld [vmem:[%s1794_s1 + $0x140] ss:$8 sps:$4 sm:$0xff]   ;;  %v1194_v10 = vld [vmem:[%s1794_s1 + $0x154] ss:$8 sps:$4 sm:$0xff]   ;;  %v1196_v11 = vld [vmem:[%s1794_s1 + $0x150] ss:$8 sps:$4 sm:$0xff]  }
   0x5   :  { %v1221_v12 = vld [vmem:[%s1794_s1 + $0x4] ss:$8 sps:$4 sm:$0xff]   ;;  %v1223_v13 = vld [vmem:[%s1794_s1] ss:$8 sps:$4 sm:$0xff]   ;;  %v1227_v15 = vld [vmem:[%s1794_s1 + $0x14] ss:$8 sps:$4 sm:$0xff]  }
   0x6   :  { %v1197_v14 = vld [vmem:[%s1794_s1 + $0x164] ss:$8 sps:$4 sm:$0xff]   ;;  %654 = vmatprep.subr.bf16.mxu1 %v1221_v12  ;;  %v1229_v16 = vld [vmem:[%s1794_s1 + $0x10] ss:$8 sps:$4 sm:$0xff]   ;;  %v1199_v17 = vld [vmem:[%s1794_s1 + $0x160] ss:$8 sps:$4 sm:$0xff]  }
   0x7   :  { %698 = vmatpush1.bf16.msra.mxu0 %v1184_v3  ;;  %655 = vmatpush1.bf16.msra.mxu1 %v1223_v13  ;;  %v1200_v18 = vld [vmem:[%s1794_s1 + $0x174] ss:$8 sps:$4 sm:$0xff]   ;;  %v1233_v19 = vld [vmem:[%s1794_s1 + $0x24] ss:$8 sps:$4 sm:$0xff]   ;;  %v1202_v21 = vld [vmem:[%s1794_s1 + $0x170] ss:$8 sps:$4 sm:$0xff]  }
   0x8   :  { %699 = vmatprep.subr.bf16.mxu0 %v1185_v4  ;;  %656 = vmatprep.subr.bf16.mxu1 %v1227_v15  ;;  %v1472_v20 = vld [vmem:[%s1793_s0 + $0x8] sm:$0xff]  ;;  %v1241_v24 = vld [vmem:[%s1794_s1 + $0x34] ss:$8 sps:$4 sm:$0xff]   ;;  %v1243_v27 = vld [vmem:[%s1794_s1 + $0x30] ss:$8 sps:$4 sm:$0xff]  }
   0x9   :  { %v1235_v22 = vld [vmem:[%s1794_s1 + $0x20] ss:$8 sps:$4 sm:$0xff]   ;;  %v1025_v23 = vcombine.high %v1472_v20, %v1472_v20  ;;  %v1203_v25 = vld [vmem:[%s1794_s1 + $0x184] ss:$8 sps:$4 sm:$0xff]   ;;  %v1206_v29 = vld [vmem:[%s1794_s1 + $0x194] ss:$8 sps:$4 sm:$0xff]   ;;  %v1024_v60 = vcombine.low %v1472_v20, %v1472_v20 }
   0xa   :  { %v1205_v26 = vld [vmem:[%s1794_s1 + $0x180] ss:$8 sps:$4 sm:$0xff]   ;;  %v1247_v28 = vld [vmem:[%s1794_s1 + $0x44] ss:$8 sps:$4 sm:$0xff]   ;;  %v1208_v30 = vld [vmem:[%s1794_s1 + $0x190] ss:$8 sps:$4 sm:$0xff]  }
   0xb   :  { %700 = vmatpush1.bf16.msra.mxu0 %v1187_v5  ;;  %657 = vmatpush1.bf16.msra.mxu1 %v1229_v16  ;;  %v1249_v31 = vld [vmem:[%s1794_s1 + $0x40] ss:$8 sps:$4 sm:$0xff]   ;;  %v1253_v32 = vld [vmem:[%s1794_s1 + $0x54] ss:$8 sps:$4 sm:$0xff]   ;;  %v1209_v33 = vld [vmem:[%s1794_s1 + $0x1a4] ss:$8 sps:$4 sm:$0xff]  }
   0xc   :  { %701 = vmatprep.subr.bf16.mxu0 %v1188_v6  ;;  %658 = vmatprep.subr.bf16.mxu1 %v1233_v19  ;;  %v1211_v34 = vld [vmem:[%s1794_s1 + $0x1a0] ss:$8 sps:$4 sm:$0xff]   ;;  %v1255_v35 = vld [vmem:[%s1794_s1 + $0x50] ss:$8 sps:$4 sm:$0xff]   ;;  %v1259_v36 = vld [vmem:[%s1794_s1 + $0x64] ss:$8 sps:$4 sm:$0xff]  }
   0xd   :  { %727 = vmatprep.mubr.bf16.mxu0 %v1025_v23  ;;  %v1212_v37 = vld [vmem:[%s1794_s1 + $0x1b4] ss:$8 sps:$4 sm:$0xff]   ;;  %v1214_v38 = vld [vmem:[%s1794_s1 + $0x1b0] ss:$8 sps:$4 sm:$0xff]   ;;  %v1261_v39 = vld [vmem:[%s1794_s1 + $0x60] ss:$8 sps:$4 sm:$0xff]  }
   0xe   :  { %v1265_v40 = vld [vmem:[%s1794_s1 + $0x74] ss:$8 sps:$4 sm:$0xff]   ;;  %v1215_v41 = vld [vmem:[%s1794_s1 + $0x1c4] ss:$8 sps:$4 sm:$0xff]   ;;  %v1217_v42 = vld [vmem:[%s1794_s1 + $0x1c0] ss:$8 sps:$4 sm:$0xff]  }
   0xf   :  { %702 = vmatpush1.bf16.msra.mxu0 %v1190_v7  ;;  %659 = vmatpush1.bf16.msra.mxu1 %v1235_v22  ;;  %v1267_v43 = vld [vmem:[%s1794_s1 + $0x70] ss:$8 sps:$4 sm:$0xff]   ;;  %v1271_v44 = vld [vmem:[%s1794_s1 + $0x84] ss:$8 sps:$4 sm:$0xff]   ;;  %v1218_v45 = vld [vmem:[%s1794_s1 + $0x1d4] ss:$8 sps:$4 sm:$0xff]  }
  0x10   :  { %703 = vmatprep.subr.bf16.mxu0 %v1191_v8  ;;  %660 = vmatprep.subr.bf16.mxu1 %v1241_v24  ;;  %v1220_v46 = vld [vmem:[%s1794_s1 + $0x1d0] ss:$8 sps:$4 sm:$0xff]   ;;  %v1273_v47 = vld [vmem:[%s1794_s1 + $0x80] ss:$8 sps:$4 sm:$0xff]   ;;  %v1277_v48 = vld [vmem:[%s1794_s1 + $0x94] ss:$8 sps:$4 sm:$0xff]  }
  0x11   :  { %v1224_v49 = vld [vmem:[%s1794_s1 + $0x1e4] ss:$8 sps:$4 sm:$0xff]   ;;  %v1226_v50 = vld [vmem:[%s1794_s1 + $0x1e0] ss:$8 sps:$4 sm:$0xff]   ;;  %v1279_v51 = vld [vmem:[%s1794_s1 + $0x90] ss:$8 sps:$4 sm:$0xff]  }
  0x12   :  { %v1283_v52 = vld [vmem:[%s1794_s1 + $0xa4] ss:$8 sps:$4 sm:$0xff]   ;;  %v1230_v53 = vld [vmem:[%s1794_s1 + $0x1f4] ss:$8 sps:$4 sm:$0xff]   ;;  %v1232_v54 = vld [vmem:[%s1794_s1 + $0x1f0] ss:$8 sps:$4 sm:$0xff]  }
  0x13   :  { %704 = vmatpush1.bf16.msra.mxu0 %v1193_v9  ;;  %661 = vmatpush1.bf16.msra.mxu1 %v1243_v27  ;;  %v1285_v55 = vld [vmem:[%s1794_s1 + $0xa0] ss:$8 sps:$4 sm:$0xff]   ;;  %v1289_v56 = vld [vmem:[%s1794_s1 + $0xb4] ss:$8 sps:$4 sm:$0xff]   ;;  %v1240_v57 = vld [vmem:[%s1794_s1 + $0x204] ss:$8 sps:$4 sm:$0xff]  }
  0x14   :  { %705 = vmatprep.subr.bf16.mxu0 %v1194_v10  ;;  %662 = vmatprep.subr.bf16.mxu1 %v1247_v28  ;;  %v1238_v58 = vld [vmem:[%s1794_s1 + $0x200] ss:$8 sps:$4 sm:$0xff]   ;;  %v1291_v61 = vld [vmem:[%s1794_s1 + $0xb0] ss:$8 sps:$4 sm:$0xff]   ;;  %v1295_v63 = vld [vmem:[%s1794_s1 + $0xc4] ss:$8 sps:$4 sm:$0xff]  }
  0x15   :  { %v22_v59 = vld [vmem:[%s1793_s0] sm:$0xff]  ;;  %v1246_v0 = vld [vmem:[%s1794_s1 + $0x214] ss:$8 sps:$4 sm:$0xff]   ;;  %v1244_v1 = vld [vmem:[%s1794_s1 + $0x210] ss:$8 sps:$4 sm:$0xff]  }
  0x16   :  { %v1023_v62 = vcombine.high %v22_v59, %v22_v59  ;;  %v1297_v2 = vld [vmem:[%s1794_s1 + $0xc0] ss:$8 sps:$4 sm:$0xff]   ;;  %v1610_v3 = vld [vmem:[%s1793_s0 + $0x10] sm:$0xff]  ;;  %v1252_v6 = vld [vmem:[%s1794_s1 + $0x224] ss:$8 sps:$4 sm:$0xff]  }
  0x17   :  { %706 = vmatpush1.bf16.msra.mxu0 %v1196_v11  ;;  %663 = vmatpush1.bf16.msra.mxu1 %v1249_v31  ;;  %v1301_v4 = vld [vmem:[%s1794_s1 + $0xd4] ss:$8 sps:$4 sm:$0xff]   ;;  %v1027_v5 = vcombine.high %v1610_v3, %v1610_v3  ;;  %v1250_v7 = vld [vmem:[%s1794_s1 + $0x220] ss:$8 sps:$4 sm:$0xff]   ;;  %v1303_v9 = vld [vmem:[%s1794_s1 + $0xd0] ss:$8 sps:$4 sm:$0xff]  }
  0x18   :  { %707 = vmatprep.subr.bf16.mxu0 %v1197_v14  ;;  %664 = vmatprep.subr.bf16.mxu1 %v1253_v32  ;;  %v1258_v8 = vld [vmem:[%s1794_s1 + $0x234] ss:$8 sps:$4 sm:$0xff]   ;;  %v1307_v10 = vld [vmem:[%s1794_s1 + $0xe4] ss:$8 sps:$4 sm:$0xff]   ;;  %v1309_v11 = vld [vmem:[%s1794_s1 + $0xe0] ss:$8 sps:$4 sm:$0xff]  }
  0x19   :  { %686 = vmatprep.mubr.bf16.mxu1 %v1023_v62  ;;  %v1256_v12 = vld [vmem:[%s1794_s1 + $0x230] ss:$8 sps:$4 sm:$0xff]   ;;  %v1313_v13 = vld [vmem:[%s1794_s1 + $0xf4] ss:$8 sps:$4 sm:$0xff]   ;;  %v1264_v14 = vld [vmem:[%s1794_s1 + $0x244] ss:$8 sps:$4 sm:$0xff]  }
  0x1a   :  { %v1315_v15 = vld [vmem:[%s1794_s1 + $0xf0] ss:$8 sps:$4 sm:$0xff]   ;;  %v1262_v16 = vld [vmem:[%s1794_s1 + $0x240] ss:$8 sps:$4 sm:$0xff]  }
  0x1b   :  { %708 = vmatpush1.bf16.msra.mxu0 %v1199_v17  ;;  %665 = vmatpush1.bf16.msra.mxu1 %v1255_v35  ;;  %v1326_v17 = vld [vmem:[%s1794_s1 + $0x304] ss:$8 sps:$4 sm:$0xff]  }
  0x1c   :  { %709 = vmatprep.subr.bf16.mxu0 %v1200_v18  ;;  %666 = vmatprep.subr.bf16.mxu1 %v1259_v36  ;;  %v1270_v18 = vld [vmem:[%s1794_s1 + $0x254] ss:$8 sps:$4 sm:$0xff]  }
  0x1f   :  { %710 = vmatpush1.bf16.msra.mxu0 %v1202_v21  ;;  %667 = vmatpush1.bf16.msra.mxu1 %v1261_v39 }
  0x20   :  { %711 = vmatprep.subr.bf16.mxu0 %v1203_v25  ;;  %668 = vmatprep.subr.bf16.mxu1 %v1265_v40 }
  0x23   :  { %712 = vmatpush1.bf16.msra.mxu0 %v1205_v26  ;;  %669 = vmatpush1.bf16.msra.mxu1 %v1267_v43 }
  0x24   :  { %713 = vmatprep.subr.bf16.mxu0 %v1206_v29  ;;  %670 = vmatprep.subr.bf16.mxu1 %v1271_v44 }
  0x27   :  { %714 = vmatpush1.bf16.msra.mxu0 %v1208_v30  ;;  %671 = vmatpush1.bf16.msra.mxu1 %v1273_v47 }
  0x28   :  { %715 = vmatprep.subr.bf16.mxu0 %v1209_v33  ;;  %672 = vmatprep.subr.bf16.mxu1 %v1277_v48 }
  0x2b   :  { %716 = vmatpush1.bf16.msra.mxu0 %v1211_v34  ;;  %673 = vmatpush1.bf16.msra.mxu1 %v1279_v51 }
  0x2c   :  { %717 = vmatprep.subr.bf16.mxu0 %v1212_v37  ;;  %674 = vmatprep.subr.bf16.mxu1 %v1283_v52 }
  0x2f   :  { %718 = vmatpush1.bf16.msra.mxu0 %v1214_v38  ;;  %675 = vmatpush1.bf16.msra.mxu1 %v1285_v55 }
  0x30   :  { %719 = vmatprep.subr.bf16.mxu0 %v1215_v41  ;;  %676 = vmatprep.subr.bf16.mxu1 %v1289_v56 }
  0x33   :  { %720 = vmatpush1.bf16.msra.mxu0 %v1217_v42  ;;  %677 = vmatpush1.bf16.msra.mxu1 %v1291_v61 }
  0x34   :  { %721 = vmatprep.subr.bf16.mxu0 %v1218_v45  ;;  %678 = vmatprep.subr.bf16.mxu1 %v1295_v63 }
  0x37   :  { %722 = vmatpush1.bf16.msra.mxu0 %v1220_v46  ;;  %679 = vmatpush1.bf16.msra.mxu1 %v1297_v2 }
  0x38   :  { %723 = vmatprep.subr.bf16.mxu0 %v1224_v49  ;;  %680 = vmatprep.subr.bf16.mxu1 %v1301_v4 }
  0x3b   :  { %724 = vmatpush1.bf16.msra.mxu0 %v1226_v50  ;;  %681 = vmatpush1.bf16.msra.mxu1 %v1303_v9 }
  0x3c   :  { %725 = vmatprep.subr.bf16.mxu0 %v1230_v53  ;;  %682 = vmatprep.subr.bf16.mxu1 %v1307_v10 }
  0x3f   :  { %726 = vmatpush1.bf16.msra.mxu0 %v1232_v54  ;;  %683 = vmatpush1.bf16.msra.mxu1 %v1309_v11 }
  0x40   :  { %736 = vmatprep.subr.bf16.mxu0 %v1240_v57  ;;  %684 = vmatprep.subr.bf16.mxu1 %v1313_v13 }
  0x42   :  { %728 = vmatmul.mubr.bf16.vlgmr.msra.gmra.mrb[0].mxu0 %v1024_v60 }
  0x43   :  { %737 = vmatpush1.bf16.msra.mxu0 %v1238_v58  ;;  %768 = vmatprep.mubr.bf16.mxu0 %v1027_v5 }
  0x44   :  { %738 = vmatprep.subr.bf16.mxu0 %v1246_v0 }
  0x47   :  { %739 = vmatpush1.bf16.msra.mxu0 %v1244_v1 }
  0x48   :  { %740 = vmatprep.subr.bf16.mxu0 %v1252_v6 }
  0x4b   :  { %741 = vmatpush1.bf16.msra.mxu0 %v1250_v7 }
  0x4c   :  { %742 = vmatprep.subr.bf16.mxu0 %v1258_v8 }
  0x4f   :  { %743 = vmatpush1.bf16.msra.mxu0 %v1256_v12 }
  0x50   :  { %744 = vmatprep.subr.bf16.mxu0 %v1264_v14 }
  0x51   :  { %10 = vsyncpa [#allocation3], 0  ;;  %v1022_v19 = vcombine.low %v22_v59, %v22_v59  ;;  %685 = vmatpush1.bf16.msra.mxu1 %v1315_v15  ;;  %v1324_v20 = vld [vmem:[%s1794_s1 + $0x300] ss:$8 sps:$4 sm:$0xff]   ;;  %v1268_v21 = vld [vmem:[%s1794_s1 + $0x250] ss:$8 sps:$4 sm:$0xff]   ;;  %v1026_v50 = vcombine.low %v1610_v3, %v1610_v3  ;;  %v126_v5 = vlaneseq }
  0x52   :  { %777 = vmatprep.subr.bf16.mxu1 %v1326_v17  ;;  %v1333_v22 = vld [vmem:[%s1796_s3 + $0x40] sm:$0xff]   ;;  %v1377_v24 = vmov 0   ;;  %v1282_v26 = vld [vmem:[%s1794_s1 + $0x274] ss:$8 sps:$4 sm:$0xff]   ;;  %v1332_v27 = vld [vmem:[%s1793_s0 + $0x18] ss:$0 sps:$4 sm:$0xff]  }
  0x53   :  { %745 = vmatpush1.bf16.msra.mxu0 %v1262_v16  ;;  %v1276_v23 = vld [vmem:[%s1794_s1 + $0x264] ss:$8 sps:$4 sm:$0xff]   ;;  %v1274_v25 = vld [vmem:[%s1794_s1 + $0x260] ss:$8 sps:$4 sm:$0xff]   ;;  %vm650_vm0 = vcmask 130048   ;;  %v1337_v34 = vld [vmem:[%s1796_s3 + $0x50] sm:$0xff]  }
  0x54   :  { %746 = vmatprep.subr.bf16.mxu0 %v1270_v18  ;;  %687 = vmatmul.mubr.bf16.vlgmr.msra.gmra.mrb[0].mxu1 %v1022_v19  ;;  %v1334_v28 = vld [vmem:[%s1796_s3] sm:$0xff]   ;;  %v1280_v29 = vld [vmem:[%s1794_s1 + $0x270] ss:$8 sps:$4 sm:$0xff]   ;;  %v1335_v30 = vld [vmem:[%s1796_s3 + $0x48] sm:$0xff]   ;;  %v127_v6 = vshrl.u32 %v126_v5, 7  ;;  %s1378_s27 = smov [#allocation2]  }
  0x55   :  { %778 = vmatpush1.bf16.msra.mxu1 %v1324_v20  ;;  %809 = vmatprep.mubr.bf16.mxu1 %v1377_v24  ;;  %v1288_v31 = vld [vmem:[%s1794_s1 + $0x284] ss:$8 sps:$4 sm:$0xff]   ;;  %v1286_v33 = vld [vmem:[%s1794_s1 + $0x280] ss:$8 sps:$4 sm:$0xff]   ;;  %v1294_v35 = vld [vmem:[%s1794_s1 + $0x294] ss:$8 sps:$4 sm:$0xff]  }
  0x56   :  { %1145 = vmatprep.subr.bf16.mxu1 %v1333_v22  ;;  %v1336_v32 = vld [vmem:[%s1796_s3 + $0x8] sm:$0xff]   ;;  %v1338_v36 = vld [vmem:[%s1796_s3 + $0x10] sm:$0xff]   ;;  %v1339_v51 = vld [vmem:[%s1796_s3 + $0x58] sm:$0xff]   ;;  %v128_v7 = vsub.s32 0, %v127_v6  ;;  %v132_v9 = vsub.s32 1, %v127_v6  ;;  %s1014_s28 = sshll.u32 %s1378_s27, 4  ;;  %s1015_s28 = int_to_ptr.vmem [resolvable:$true] %s1014_s28 }
  0x57   :  { %747 = vmatpush1.bf16.msra.mxu0 %v1268_v21  ;;  %v1292_v37 = vld [vmem:[%s1794_s1 + $0x290] ss:$8 sps:$4 sm:$0xff]   ;;  %v1300_v38 = vld [vmem:[%s1794_s1 + $0x2a4] ss:$8 sps:$4 sm:$0xff]   ;;  %v1298_v39 = vld [vmem:[%s1794_s1 + $0x2a0] ss:$8 sps:$4 sm:$0xff]   ;;  %p1358_p1 = scmp.lt.s32.totalorder %s1015_s28, %s1015_s28 }
  0x58   :  { %748 = vmatprep.subr.bf16.mxu0 %v1276_v23  ;;  %v1306_v40 = vld [vmem:[%s1794_s1 + $0x2b4] ss:$8 sps:$4 sm:$0xff]   ;;  %v1304_v41 = vld [vmem:[%s1794_s1 + $0x2b0] ss:$8 sps:$4 sm:$0xff]   ;;  %v1312_v42 = vld [vmem:[%s1794_s1 + $0x2c4] ss:$8 sps:$4 sm:$0xff]  }
  0x59   :  { %v1310_v43 = vld [vmem:[%s1794_s1 + $0x2c0] ss:$8 sps:$4 sm:$0xff]   ;;  %v1318_v44 = vld [vmem:[%s1794_s1 + $0x2d4] ss:$8 sps:$4 sm:$0xff]   ;;  %v1316_v45 = vld [vmem:[%s1794_s1 + $0x2d0] ss:$8 sps:$4 sm:$0xff]  }
  0x5a   :  { %v1323_v46 = vld [vmem:[%s1794_s1 + $0x2e4] ss:$8 sps:$4 sm:$0xff]   ;;  %v1321_v47 = vld [vmem:[%s1794_s1 + $0x2e0] ss:$8 sps:$4 sm:$0xff]   ;;  %v1329_v48 = vld [vmem:[%s1794_s1 + $0x2f4] ss:$8 sps:$4 sm:$0xff]  }
  0x5b   :  { %749 = vmatpush1.bf16.msra.mxu0 %v1274_v25  ;;  %v1327_v49 = vld [vmem:[%s1794_s1 + $0x2f0] ss:$8 sps:$4 sm:$0xff]   ;;  %v1341_v53 = vld [vmem:[%s1796_s3 + $0x60] sm:$0xff]   ;;  %v1343_v55 = vld [vmem:[%s1796_s3 + $0x68] sm:$0xff]  }
  0x5c   :  { %750 = vmatprep.subr.bf16.mxu0 %v1282_v26  ;;  %1127 = vmatmul.mubr.msk.bf16.vlgmr.msra.gmra.mrb[4].mxu1 %vm650_vm0, %v1332_v27  ;;  %v1340_v52 = vld [vmem:[%s1796_s3 + $0x18] sm:$0xff]   ;;  %v1342_v54 = vld [vmem:[%s1796_s3 + $0x20] sm:$0xff]   ;;  %v1344_v56 = vld [vmem:[%s1796_s3 + $0x28] sm:$0xff]  }
  0x5d   :  { %1146 = vmatpush3.bf16.msra.mxu1 %v1334_v28  ;;  %v1345_v57 = vld [vmem:[%s1796_s3 + $0x70] sm:$0xff]   ;;  %v1347_v59 = vld [vmem:[%s1796_s3 + $0x78] sm:$0xff]   ;;  %v124_v8 = vld [vmem:[%s1795_s2] sm:$0x3] }
  0x5e   :  { %1147 = vmatprep.subr.bf16.mxu1 %v1335_v30  ;;  %v1346_v58 = vld [vmem:[%s1796_s3 + $0x30] sm:$0xff]   ;;  %v1348_v60 = vld [vmem:[%s1796_s3 + $0x38] sm:$0xff]   ;;  %v129_v10 = vrot.slane %v124_v8, %v128_v7  ;;  %v133_v11 = vrot.slane %v124_v8, %v132_v9  ;;  %v1128_v28 = vld [vmem:[%s1797_s4] ss:$0 sm:$0xff]  ;;  %s1353_s4 = scalar_lea.vmem %s1015_s28, 128 }
  0x5f   :  { %751 = vmatpush1.bf16.msra.mxu0 %v1280_v29  ;;  %p1354_p0 = scmp.ne.s32.totalorder %s1015_s28, %s1353_s4  ;;  %p1359_p2 = scmp.lt.s32.totalorder %s1353_s4, %s1353_s4 }
  0x60   :  { %752 = vmatprep.subr.bf16.mxu0 %v1288_v31 }
  0x61   :  { %1148 = vmatpush3.bf16.msra.mxu1 %v1336_v32  ;;  %p1360_p3 = por %p1359_p2, %p1358_p1 }
  0x62   :  { %1149 = vmatprep.subr.bf16.mxu1 %v1337_v34 }
  0x63   :  { %753 = vmatpush1.bf16.msra.mxu0 %v1286_v33  ;;  %p1361_p4 = pnand %p1360_p3, %p1354_p0 }
  0x64   :  { %754 = vmatprep.subr.bf16.mxu0 %v1294_v35 }
  0x65   :  { %1150 = vmatpush3.bf16.msra.mxu1 %v1338_v36 }
  0x66   :  { %1151 = vmatprep.subr.bf16.mxu1 %v1339_v51 }
  0x67   :  { %755 = vmatpush1.bf16.msra.mxu0 %v1292_v37 }
  0x68   :  { %756 = vmatprep.subr.bf16.mxu0 %v1300_v38 }
  0x69   :  { %1152 = vmatpush3.bf16.msra.mxu1 %v1340_v52 }
  0x6a   :  { %1153 = vmatprep.subr.bf16.mxu1 %v1341_v53 }
  0x6b   :  { %757 = vmatpush1.bf16.msra.mxu0 %v1298_v39 }
  0x6c   :  { %758 = vmatprep.subr.bf16.mxu0 %v1306_v40 }
  0x6d   :  { %1154 = vmatpush3.bf16.msra.mxu1 %v1342_v54 }
  0x6e   :  { %1155 = vmatprep.subr.bf16.mxu1 %v1343_v55 }
  0x6f   :  { %759 = vmatpush1.bf16.msra.mxu0 %v1304_v41 }
  0x70   :  { %760 = vmatprep.subr.bf16.mxu0 %v1312_v42 }
  0x71   :  { %1156 = vmatpush3.bf16.msra.mxu1 %v1344_v56 }
  0x72   :  { %1157 = vmatprep.subr.bf16.mxu1 %v1345_v57 }
  0x73   :  { %761 = vmatpush1.bf16.msra.mxu0 %v1310_v43 }
  0x74   :  { %762 = vmatprep.subr.bf16.mxu0 %v1318_v44 }
  0x75   :  { %1158 = vmatpush3.bf16.msra.mxu1 %v1346_v58 }
  0x76   :  { %1159 = vmatprep.subr.bf16.mxu1 %v1347_v59 }
  0x77   :  { %763 = vmatpush1.bf16.msra.mxu0 %v1316_v45 }
  0x78   :  { %764 = vmatprep.subr.bf16.mxu0 %v1323_v46 }
  0x79   :  { %1160 = vmatpush3.bf16.msra.mxu1 %v1348_v60 }
  0x7b   :  { %765 = vmatpush1.bf16.msra.mxu0 %v1321_v47 }
  0x7c   :  { %766 = vmatprep.subr.bf16.mxu0 %v1329_v48 }
  0x7f   :  { %767 = vmatpush1.bf16.msra.mxu0 %v1327_v49 }
  0x82   :  { %769 = vmatmul.mubr.bf16.vlgmr.msra.gmra.mrb[0].mxu0 %v1026_v50 }
 0x127   :  { %v688_v61 = vpop.f32.mrb[0].mxu1 }
 0x128   :  { %v690_v62 = vpop.f32.mrb[1].mxu1  ;;  %v689_v12 = vadd.f32 %v688_v61, %v129_v10 }
 0x129   :  { %v692_v63 = vpop.f32.mrb[2].mxu1  ;;  %v691_v13 = vadd.f32 %v690_v62, %v133_v11 }
 0x12a   :  { %v693_v0 = vpop.f32.mrb[3].mxu1 }
 0x12f   :  { %v811_v1 = vpop.f32.mrb[4].mxu1 }
 0x130   :  { %v813_v2 = vpop.f32.mrb[5].mxu1 }
 0x131   :  { %v815_v3 = vpop.f32.mrb[6].mxu1 }
 0x132   :  { %v816_v4 = vpop.f32.mrb[7].mxu1 }
 0x155   :  { %v770_v14 = vpop.f32.mrb[0].mxu0 }
 0x156   :  { %v1168_v15 = vadd.f32 %v770_v14, %v689_v12  ;;  %v772_v16 = vpop.f32.mrb[1].mxu0 }
 0x157   :  { %v1171_v17 = vadd.f32 %v772_v16, %v691_v13  ;;  %v774_v18 = vpop.f32.mrb[2].mxu0 }
 0x158   :  { %v1169_v19 = vadd.f32 %v1168_v15, %v811_v1  ;;  %v775_v20 = vpop.f32.mrb[3].mxu0 }
 0x159   :  { %v1172_v21 = vadd.f32 %v1171_v17, %v813_v2 }
 0x15a   :  { %v818_v22 = vmax.f32 %v1169_v19, 0.0 }
 0x15b   :  { %v819_v23 = vmax.f32 %v1172_v21, 0.0 }
 0x15c   :  { %v820_v25 = vpack.c.bf16 %v818_v22, %v818_v22 }
 0x15d   :  { %v821_v24 = vpack.c.bf16 %v819_v23, %v819_v23 }
 0x15f   :  { %989 = vmatprep.mubr.bf16.mxu1 %v821_v24 }
 0x160   :  { %990 = vmatmul.mubr.bf16.vlgmr.msra.gmra.mrb[8].mxu1 %v820_v25 }
 0x233   :  { %v1161_v26 = vpop.f32.mrb[8].mxu1 }
 0x234   :  { %v1162_v27 = vpop.f32.mrb[9].mxu1 }
 0x235   :  { %v1163_v29 = vadd.f32 %v1162_v27, %v1161_v26  ;;  %v1164_v30 = vpop.f32.mrb[10].mxu1 }
 0x236   :  { %v1165_v31 = vpop.f32.mrb[11].mxu1 }
 0x237   :  { %v992_v32 = vadd.f32 %v1163_v29, %v1128_v28 }
 0x239   :  { %997 = vmax.xlane.f32.xlu0 %v992_v32 }
 0x2c6   :  { %v998_v33 = vpop.xlane.xlu0 %997 }
 0x2c7   :  { %v999_v34 = vsub.f32 %v992_v32, %v998_v33 }
 0x2c9   :  { %v1000_v35 = vmul.f32 1.442695, %v999_v34 }
 0x2cb   :  { %1349 = vpow2.f32 %v1000_v35 }
 0x2d5   :  { %v1350_v36 = vpop.eup %1349 }
 0x2d6   :  { %1002 = vadd.xlane.f32.xlu0 %v1350_v36 }
 0x363   :  { %v1003_v37 = vpop.xlane.xlu0 %1002 }
 0x364   :  { %1351 = vlog2.f32 %v1003_v37 }
 0x36e   :  { %v1352_v38 = vpop.eup %1351 }
 0x36f   :  { %v1005_v39 = vmul.f32 0.6931472, %v1352_v38 }
 0x371   :  { %v1006_v40 = vsub.f32 %v999_v34, %v1005_v39 }
 0x373   :  { %1007 = vst [vmem:[#allocation2] sm:$0xff] %v1006_v40 }
 0x374   :  { %1364 = shalt.err (!%p1361_p4)
}
 0x375   :  { %s1365_s6 = scalar_lea.hbm %s1798_s5, 128 }
 0x376   :  { %p1366_p5 = scmp.ne.s32.totalorder %s1798_s5, %s1365_s6  ;;  %p1369_p6 = scmp.lt.u32.totalorder %s1365_s6, %s1798_s5 }
 0x378   :  { %p1371_p7 = pnand %p1369_p6, %p1366_p5 }
 0x37a   :  { %1374 = shalt.err (!%p1371_p7)
}
 0x37b   :  { %1017 = dma.vmem_to_hbm [thread:$0]  %s1015_s28, 128, %s1798_s5, [#allocation3]  }
 0x37c   :  { %1375 = dma.done.wait [#allocation3], 128  }
 0x37d   :  { %1376 = vsyncadd [#allocation3], 4294967168 }
 0x37e   :  { %1021 = vsyncpa [#allocation3], 1 }

</bundles_post_ra>
